<compile_context>
chip_gen: v7x
topology: tpu7x:2x2x1
jax: 0.10.0
libtpu: 0.0.40
codegen_flags: <defaults>
</compile_context>

<pallas_src>
import functools
import math

import numpy as np
import jax
import jax.numpy as jnp
from jax.experimental import pallas as pl
from jax.experimental.pallas import tpu as pltpu


# ------------------------------ kernel helpers -------------------------------

def _gelu(x):
    # exact erf-based GELU (transformers ACT2FN['gelu'])
    # TODO(synk): optional tanh-approx GELU (EUP) for v5e, gated behind a flag.
    return 0.5 * x * (1.0 + jax.lax.erf(x * (1.0 / math.sqrt(2.0))))


def _layer_norm(x, gamma, beta, eps):
    mean = jnp.mean(x, axis=-1, keepdims=True)
    var = jnp.mean(jnp.square(x - mean), axis=-1, keepdims=True)
    return (x - mean) * jax.lax.rsqrt(var + eps) * gamma + beta


# -------------------------------- Pallas kernel -------------------------------

def _bert_layer_kernel(x_ref, mask_ref,
                       wqkv_ref, bqkv_ref,
                       wo_ref, bo_ref, g1_ref, be1_ref,
                       wi_ref, bi_ref, wo2_ref, bo2_ref, g2_ref, be2_ref,
                       out_ref, *, num_heads, head_size, eps, ffn_chunk):
    x_f32 = x_ref[0].astype(jnp.float32)       # [S, H]   residual path (f32)
    x_bf = x_ref[0].astype(jnp.bfloat16)       # [S, H]   MXU operand (bf16)
    mask = mask_ref[0].astype(jnp.float32)     # [1, S]   additive attention mask
    S, H = x_f32.shape
    scale = 1.0 / math.sqrt(head_size)

    # ---------------- fused QKV projection ------------------------------------
    # one [S,H] x [H,3H] bf16 matmul, f32 accumulate
    qkv = jnp.dot(x_bf, wqkv_ref[...], preferred_element_type=jnp.float32)
    qkv = qkv + bqkv_ref[...]                  # [S, 3H]  f32

    # ---------------- per-head attention --------------------------------------
    # static unroll over heads; slices of qkv are static lane slices.
    # TODO(synk): for num_heads >= 12, group heads so sliced widths are >=128
    #             lanes and/or use lax.fori_loop to bound live ranges.
    ctx_heads = []
    for h in range(num_heads):
        q = qkv[:, h * head_size:(h + 1) * head_size]              # [S, hd]
        k = qkv[:, H + h * head_size:H + (h + 1) * head_size]      # [S, hd]
        v = qkv[:, 2 * H + h * head_size:2 * H + (h + 1) * head_size]

        # scores = q @ k^T  (contract head dim, bf16 operands, f32 accumulate)
        scores = jax.lax.dot_general(
            q.astype(jnp.bfloat16), k.astype(jnp.bfloat16),
            (((1,), (1,)), ((), ())),
            preferred_element_type=jnp.float32) * scale
        scores = scores + mask                                      # [S,S]+[1,S]

        # deferred-normalization softmax (f32 math, divide folded into a
        # post-matmul scale using the EUP reciprocal)
        m = jnp.max(scores, axis=-1, keepdims=True)
        e = jnp.exp(scores - m)                                     # [S, S]
        denom = jnp.sum(e, axis=-1, keepdims=True)                  # [S, 1]
        # TODO(synk): attention_probs dropout (eval mode => identity)
        # TODO(synk): head_mask multiply not supported (assumed None)

        ctx = jnp.dot(e.astype(jnp.bfloat16), v.astype(jnp.bfloat16),
                      preferred_element_type=jnp.float32)           # [S, hd]
        ctx = ctx * pl.reciprocal(denom, approx=True)
        ctx_heads.append(ctx)

    ctx_all = jnp.concatenate(ctx_heads, axis=-1)                   # [S, H]

    # ---------------- attention output projection + residual + LN -------------
    attn_dense = jnp.dot(ctx_all.astype(jnp.bfloat16), wo_ref[...],
                         preferred_element_type=jnp.float32) + bo_ref[...]
    # TODO(synk): hidden dropout (eval mode => identity)
    attn_out = _layer_norm(attn_dense + x_f32, g1_ref[...], be1_ref[...], eps)

    # ---------------- FFN: (H -> I) GELU (I -> H), chunked over I --------------
    attn_out_bf = attn_out.astype(jnp.bfloat16)
    I = wi_ref.shape[1]
    ffn = jnp.zeros((S, H), jnp.float32)
    for c0 in range(0, I, ffn_chunk):
        inter = jnp.dot(attn_out_bf, wi_ref[:, c0:c0 + ffn_chunk],
                        preferred_element_type=jnp.float32)
        inter = _gelu(inter + bi_ref[:, c0:c0 + ffn_chunk])
        ffn = ffn + jnp.dot(inter.astype(jnp.bfloat16),
                            wo2_ref[c0:c0 + ffn_chunk, :],
                            preferred_element_type=jnp.float32)

    out = ffn + bo2_ref[...]
    # TODO(synk): hidden dropout (eval mode => identity)
    out = _layer_norm(out + attn_out, g2_ref[...], be2_ref[...], eps)

    out_ref[0] = out.astype(out_ref.dtype)


# ------------------------------- host wrapper ---------------------------------

def _vmem_limit_bytes():
    # ~100 MiB on v5e/v6e (128 MiB physical), ~56 MiB on v7x (64 MiB physical).
    try:
        cap = pltpu.get_tpu_info().vmem_capacity_bytes
        return int(min(100 * 1024 * 1024, cap - 8 * 1024 * 1024))
    except Exception:
        return 56 * 1024 * 1024


@functools.partial(jax.jit, static_argnames=("num_heads", "eps", "ffn_chunk"))
def bert_layer(hidden_states, attention_mask, params, *, num_heads, eps=1e-12,
               ffn_chunk=None):
    """Mirrors BertLayer.forward (encoder, eval mode).

    hidden_states : [B, S, H] float32
    attention_mask: [B, S] additive mask (0 keep, -10000 masked) or None
    returns       : [B, S, H] float32
    """
    B, S, H = hidden_states.shape
    assert H % num_heads == 0
    hd = H // num_heads
    I = params["wi"].shape[1]
    if ffn_chunk is None:
        ffn_chunk = min(I, 512)
    assert I % ffn_chunk == 0

    if attention_mask is None:
        attention_mask = jnp.zeros((B, S), jnp.float32)
    mask3 = attention_mask.astype(jnp.float32).reshape(B, 1, S)

    # fused QKV weight/bias (host-side, trace-time); matmul weights in bf16.
    wqkv = jnp.concatenate([params["wq"], params["wk"], params["wv"]],
                           axis=1).astype(jnp.bfloat16)        # [H, 3H]
    bqkv = jnp.concatenate([params["bq"], params["bk"], params["bv"]],
                           axis=1).astype(jnp.float32)         # [1, 3H]
    wo_bf = params["wo"].astype(jnp.bfloat16)                  # [H, H]
    wi_bf = params["wi"].astype(jnp.bfloat16)                  # [H, I]
    wo2_bf = params["wo2"].astype(jnp.bfloat16)                # [I, H]

    kernel = functools.partial(_bert_layer_kernel,
                               num_heads=num_heads, head_size=hd, eps=eps,
                               ffn_chunk=ffn_chunk)

    const = lambda *_: (0, 0)
    # TODO(synk): weight specs could use pipeline_mode=pl.Buffered(1) to drop the
    #             redundant double buffer for revisited constant blocks.
    # TODO(synk): add a second "parallel" grid axis over S (query tiles) to use
    #             both TensorCores on v7x at small batch and cap the [S,S] buffer.

    grid_spec = pltpu.PrefetchScalarGridSpec(
        num_scalar_prefetch=0,
        grid=(B,),
        in_specs=[
            pl.BlockSpec((1, S, H), lambda b: (b, 0, 0)),       # x
            pl.BlockSpec((1, 1, S), lambda b: (b, 0, 0)),       # additive mask
            pl.BlockSpec((H, 3 * H), const),                    # Wqkv (bf16)
            pl.BlockSpec((1, 3 * H), const),                    # bqkv
            pl.BlockSpec((H, H), const),                        # Wo (bf16)
            pl.BlockSpec((1, H), const),                        # bo
            pl.BlockSpec((1, H), const),                        # LN1 gamma
            pl.BlockSpec((1, H), const),                        # LN1 beta
            pl.BlockSpec((H, I), const),                        # Wi (bf16)
            pl.BlockSpec((1, I), const),                        # bi
            pl.BlockSpec((I, H), const),                        # Wo2 (bf16)
            pl.BlockSpec((1, H), const),                        # bo2
            pl.BlockSpec((1, H), const),                        # LN2 gamma
            pl.BlockSpec((1, H), const),                        # LN2 beta
        ],
        out_specs=pl.BlockSpec((1, S, H), lambda b: (b, 0, 0)),
    )

    flops = int(B * (8 * S * H * H + 4 * S * S * H + 4 * S * H * I))
    transcendentals = int(B * (num_heads * S * S + S * I))
    bytes_accessed = int(4 * (2 * B * S * H + B * S)
                         + 2 * (4 * H * H + 2 * H * I)          # bf16 weights
                         + 4 * (3 * H + 8 * H + I))             # f32 biases/LN

    return pl.pallas_call(
        kernel,
        out_shape=jax.ShapeDtypeStruct((B, S, H), jnp.float32),
        grid_spec=grid_spec,
        compiler_params=pltpu.CompilerParams(
            dimension_semantics=("parallel",),
            vmem_limit_bytes=_vmem_limit_bytes()),
        cost_estimate=pl.CostEstimate(flops=flops,
                                      transcendentals=transcendentals,
                                      bytes_accessed=bytes_accessed),
    )(hidden_states, mask3,
      wqkv, bqkv,
      wo_bf, params["bo"], params["gamma1"], params["beta1"],
      wi_bf, params["bi"], wo2_bf, params["bo2"],
      params["gamma2"], params["beta2"])


# ------------------------------ pure-JAX reference ----------------------------

def bert_layer_reference(x, attention_mask, params, *, num_heads, eps=1e-12):
    B, S, H = x.shape
    hd = H // num_heads
    prec = jax.lax.Precision.HIGHEST

    def dense(t, w, b):
        return jnp.einsum("bsh,ho->bso", t, w, precision=prec) + b

    def to_heads(t):
        return jnp.transpose(t.reshape(B, S, num_heads, hd), (0, 2, 1, 3))

    q = to_heads(dense(x, params["wq"], params["bq"]))
    k = to_heads(dense(x, params["wk"], params["bk"]))
    v = to_heads(dense(x, params["wv"], params["bv"]))

    scores = jnp.einsum("bhqd,bhkd->bhqk", q, k, precision=prec) / math.sqrt(hd)
    if attention_mask is not None:
        scores = scores + attention_mask[:, None, None, :]
    probs = jax.nn.softmax(scores, axis=-1)
    ctx = jnp.einsum("bhqk,bhkd->bhqd", probs, v, precision=prec)
    ctx = jnp.transpose(ctx, (0, 2, 1, 3)).reshape(B, S, H)

    attn_dense = dense(ctx, params["wo"], params["bo"])
    attn_out = _layer_norm(attn_dense + x, params["gamma1"], params["beta1"], eps)

    inter = _gelu(dense(attn_out, params["wi"], params["bi"]))
    out = dense(inter, params["wo2"], params["bo2"])
    out = _layer_norm(out + attn_out, params["gamma2"], params["beta2"], eps)
    return out


# --------------------------------- params -------------------------------------

def init_params(key, hidden_size, intermediate_size, initializer_range=0.02):
    ks = jax.random.split(key, 12)

    def w(k, shape):
        return jax.random.normal(k, shape, jnp.float32) * initializer_range

    return {
        # torch Linear weights are [out, in]; stored transposed [in, out] here.
        "wq": w(ks[0], (hidden_size, hidden_size)),
        "bq": w(ks[1], (1, hidden_size)),
        "wk": w(ks[2], (hidden_size, hidden_size)),
        "bk": w(ks[3], (1, hidden_size)),
        "wv": w(ks[4], (hidden_size, hidden_size)),
        "bv": w(ks[5], (1, hidden_size)),
        "wo": w(ks[6], (hidden_size, hidden_size)),
        "bo": w(ks[7], (1, hidden_size)),
        "gamma1": jnp.ones((1, hidden_size), jnp.float32),
        "beta1": jnp.zeros((1, hidden_size), jnp.float32),
        "wi": w(ks[8], (hidden_size, intermediate_size)),
        "bi": w(ks[9], (1, intermediate_size)),
        "wo2": w(ks[10], (intermediate_size, hidden_size)),
        "bo2": w(ks[11], (1, hidden_size)),
        "gamma2": jnp.ones((1, hidden_size), jnp.float32),
        "beta2": jnp.zeros((1, hidden_size), jnp.float32),
    }


# ----------------------------------- main --------------------------------------

if __name__ == "__main__":
    # small shapes; hd = H/NH = 8, I chunked in two 128-wide pieces to exercise
    # the chunked-FFN code path.
    B, S, H, NH, I = 2, 8, 32, 4, 256

    key = jax.random.PRNGKey(0)
    kx, kp, km = jax.random.split(key, 3)

    x = jax.random.normal(kx, (B, S, H), jnp.float32)
    params = init_params(kp, H, I, initializer_range=0.02)

    # 0/1 keep mask -> HF-style additive mask (0 keep, -10000 masked)
    keep = (jax.random.uniform(km, (B, S)) > 0.2).astype(jnp.float32)
    keep = keep.at[:, 0].set(1.0)
    attn_mask = (1.0 - keep) * -10000.0

    out = bert_layer(x, attn_mask, params, num_heads=NH, ffn_chunk=128)
    jax.block_until_ready(out)

    ref = bert_layer_reference(x, attn_mask, params, num_heads=NH)
    # bf16 MXU operands + approx reciprocal -> looser tolerance than the f32 v1.
    np.testing.assert_allclose(np.asarray(out), np.asarray(ref),
                               rtol=2e-2, atol=2e-2)

    print("KERNEL_OK")
</pallas_src>

<mosaic_0001>
module attributes {stable_mosaic.version = 11 : i64} {
  func.func @_bert_layer_kernel(%arg0: i32, %arg1: memref<1x8x32xf32, #tpu.memory_space<vmem>>, %arg2: memref<1x1x8xf32, #tpu.memory_space<vmem>>, %arg3: memref<32x96xbf16, #tpu.memory_space<vmem>>, %arg4: memref<1x96xf32, #tpu.memory_space<vmem>>, %arg5: memref<32x32xbf16, #tpu.memory_space<vmem>>, %arg6: memref<1x32xf32, #tpu.memory_space<vmem>>, %arg7: memref<1x32xf32, #tpu.memory_space<vmem>>, %arg8: memref<1x32xf32, #tpu.memory_space<vmem>>, %arg9: memref<32x256xbf16, #tpu.memory_space<vmem>>, %arg10: memref<1x256xf32, #tpu.memory_space<vmem>>, %arg11: memref<256x32xbf16, #tpu.memory_space<vmem>>, %arg12: memref<1x32xf32, #tpu.memory_space<vmem>>, %arg13: memref<1x32xf32, #tpu.memory_space<vmem>>, %arg14: memref<1x32xf32, #tpu.memory_space<vmem>>, %arg15: memref<1x8x32xf32, #tpu.memory_space<vmem>>) attributes {dimension_semantics = [#tpu.dimension_semantics<parallel>], iteration_bounds = array<i64: 2>, scalar_prefetch = 0 : i64, scratch_operands = 0 : i64, tpu.core_type = #tpu.core_type<tc>, window_params = [{transform_indices = @transform_0, window_bounds = array<i64: 1, 8, 32>}, {transform_indices = @transform_1, window_bounds = array<i64: 1, 1, 8>}, {pipeline_mode = #tpu.pipeline_mode<synchronous>, transform_indices = @transform_2, window_bounds = array<i64: 32, 96>}, {pipeline_mode = #tpu.pipeline_mode<synchronous>, transform_indices = @transform_3, window_bounds = array<i64: 1, 96>}, {pipeline_mode = #tpu.pipeline_mode<synchronous>, transform_indices = @transform_4, window_bounds = array<i64: 32, 32>}, {pipeline_mode = #tpu.pipeline_mode<synchronous>, transform_indices = @transform_5, window_bounds = array<i64: 1, 32>}, {pipeline_mode = #tpu.pipeline_mode<synchronous>, transform_indices = @transform_6, window_bounds = array<i64: 1, 32>}, {pipeline_mode = #tpu.pipeline_mode<synchronous>, transform_indices = @transform_7, window_bounds = array<i64: 1, 32>}, {pipeline_mode = #tpu.pipeline_mode<synchronous>, transform_indices = @transform_8, window_bounds = array<i64: 32, 256>}, {pipeline_mode = #tpu.pipeline_mode<synchronous>, transform_indices = @transform_9, window_bounds = array<i64: 1, 256>}, {pipeline_mode = #tpu.pipeline_mode<synchronous>, transform_indices = @transform_10, window_bounds = array<i64: 256, 32>}, {pipeline_mode = #tpu.pipeline_mode<synchronous>, transform_indices = @transform_11, window_bounds = array<i64: 1, 32>}, {pipeline_mode = #tpu.pipeline_mode<synchronous>, transform_indices = @transform_12, window_bounds = array<i64: 1, 32>}, {pipeline_mode = #tpu.pipeline_mode<synchronous>, transform_indices = @transform_13, window_bounds = array<i64: 1, 32>}, {transform_indices = @transform_14, window_bounds = array<i64: 1, 8, 32>}]} {
    %c0 = arith.constant 0 : index
    %c0_0 = arith.constant 0 : index
    %c0_1 = arith.constant 0 : index
    %0 = vector.load %arg1[%c0, %c0_0, %c0_1] : memref<1x8x32xf32, #tpu.memory_space<vmem>>, vector<1x8x32xf32>
    %1 = vector.shape_cast %0 : vector<1x8x32xf32> to vector<8x32xf32>
    %c0_2 = arith.constant 0 : index
    %c0_3 = arith.constant 0 : index
    %c0_4 = arith.constant 0 : index
    %2 = vector.load %arg1[%c0_2, %c0_3, %c0_4] : memref<1x8x32xf32, #tpu.memory_space<vmem>>, vector<1x8x32xf32>
    %3 = vector.shape_cast %2 : vector<1x8x32xf32> to vector<8x32xf32>
    %4 = arith.truncf %3 : vector<8x32xf32> to vector<8x32xbf16>
    %c0_5 = arith.constant 0 : index
    %c0_6 = arith.constant 0 : index
    %c0_7 = arith.constant 0 : index
    %5 = vector.load %arg2[%c0_5, %c0_6, %c0_7] : memref<1x1x8xf32, #tpu.memory_space<vmem>>, vector<1x1x8xf32>
    %6 = vector.shape_cast %5 : vector<1x1x8xf32> to vector<1x8xf32>
    %c0_8 = arith.constant 0 : index
    %c0_9 = arith.constant 0 : index
    %7 = vector.load %arg3[%c0_8, %c0_9] : memref<32x96xbf16, #tpu.memory_space<vmem>>, vector<32x96xbf16>
    %cst = arith.constant dense<0.000000e+00> : vector<8x96xf32>
    %8 = tpu.matmul %4, %7, %cst {dimension_numbers = #tpu.dot_dimension_numbers<[1], [0], [0], [1], [0, 0, 1, 1], [], []>} : vector<8x32xbf16>, vector<32x96xbf16>, vector<8x96xf32> -> vector<8x96xf32>
    %c0_10 = arith.constant 0 : index
    %c0_11 = arith.constant 0 : index
    %9 = vector.load %arg4[%c0_10, %c0_11] : memref<1x96xf32, #tpu.memory_space<vmem>>, vector<1x96xf32>
    %10 = vector.broadcast %9 : vector<1x96xf32> to vector<8x96xf32>
    %11 = arith.addf %8, %10 : vector<8x96xf32>
    %12 = vector.extract_strided_slice %11 {offsets = [0, 0], sizes = [8, 8], strides = [1, 1]} : vector<8x96xf32> to vector<8x8xf32>
    %13 = vector.extract_strided_slice %11 {offsets = [0, 32], sizes = [8, 8], strides = [1, 1]} : vector<8x96xf32> to vector<8x8xf32>
    %14 = vector.extract_strided_slice %11 {offsets = [0, 64], sizes = [8, 8], strides = [1, 1]} : vector<8x96xf32> to vector<8x8xf32>
    %15 = arith.truncf %12 : vector<8x8xf32> to vector<8x8xbf16>
    %16 = arith.truncf %13 : vector<8x8xf32> to vector<8x8xbf16>
    %cst_12 = arith.constant dense<0.000000e+00> : vector<8x8xf32>
    %17 = tpu.matmul %15, %16, %cst_12 {dimension_numbers = #tpu.dot_dimension_numbers<[1], [1], [0], [0], [0, 0, 1, 0], [], []>} : vector<8x8xbf16>, vector<8x8xbf16>, vector<8x8xf32> -> vector<8x8xf32>
    %cst_13 = arith.constant 0.353553385 : f32
    %18 = vector.broadcast %cst_13 : f32 to vector<8x8xf32>
    %19 = arith.mulf %17, %18 : vector<8x8xf32>
    %20 = vector.broadcast %6 : vector<1x8xf32> to vector<8x8xf32>
    %21 = arith.addf %19, %20 : vector<8x8xf32>
    %cst_14 = arith.constant dense<0xFF800000> : vector<8xf32>
    %22 = vector.multi_reduction <maximumf>, %21, %cst_14 [1] : vector<8x8xf32> to vector<8xf32>
    %23 = vector.shape_cast %22 : vector<8xf32> to vector<8x1xf32>
    %24 = vector.broadcast %23 : vector<8x1xf32> to vector<8x8xf32>
    %25 = arith.subf %21, %24 : vector<8x8xf32>
    %26 = math.exp %25 : vector<8x8xf32>
    %cst_15 = arith.constant dense<0.000000e+00> : vector<8xf32>
    %27 = vector.multi_reduction <add>, %26, %cst_15 [1] : vector<8x8xf32> to vector<8xf32>
    %28 = vector.shape_cast %27 : vector<8xf32> to vector<8x1xf32>
    %29 = arith.truncf %26 : vector<8x8xf32> to vector<8x8xbf16>
    %30 = arith.truncf %14 : vector<8x8xf32> to vector<8x8xbf16>
    %cst_16 = arith.constant dense<0.000000e+00> : vector<8x8xf32>
    %31 = tpu.matmul %29, %30, %cst_16 {dimension_numbers = #tpu.dot_dimension_numbers<[1], [0], [0], [1], [0, 0, 1, 1], [], []>} : vector<8x8xbf16>, vector<8x8xbf16>, vector<8x8xf32> -> vector<8x8xf32>
    %32 = tpu.reciprocal %28 {approx = true} : vector<8x1xf32> -> vector<8x1xf32>
    %33 = vector.broadcast %32 : vector<8x1xf32> to vector<8x8xf32>
    %34 = arith.mulf %31, %33 : vector<8x8xf32>
    %35 = vector.extract_strided_slice %11 {offsets = [0, 8], sizes = [8, 8], strides = [1, 1]} : vector<8x96xf32> to vector<8x8xf32>
    %36 = vector.extract_strided_slice %11 {offsets = [0, 40], sizes = [8, 8], strides = [1, 1]} : vector<8x96xf32> to vector<8x8xf32>
    %37 = vector.extract_strided_slice %11 {offsets = [0, 72], sizes = [8, 8], strides = [1, 1]} : vector<8x96xf32> to vector<8x8xf32>
    %38 = arith.truncf %35 : vector<8x8xf32> to vector<8x8xbf16>
    %39 = arith.truncf %36 : vector<8x8xf32> to vector<8x8xbf16>
    %cst_17 = arith.constant dense<0.000000e+00> : vector<8x8xf32>
    %40 = tpu.matmul %38, %39, %cst_17 {dimension_numbers = #tpu.dot_dimension_numbers<[1], [1], [0], [0], [0, 0, 1, 0], [], []>} : vector<8x8xbf16>, vector<8x8xbf16>, vector<8x8xf32> -> vector<8x8xf32>
    %cst_18 = arith.constant 0.353553385 : f32
    %41 = vector.broadcast %cst_18 : f32 to vector<8x8xf32>
    %42 = arith.mulf %40, %41 : vector<8x8xf32>
    %43 = vector.broadcast %6 : vector<1x8xf32> to vector<8x8xf32>
    %44 = arith.addf %42, %43 : vector<8x8xf32>
    %cst_19 = arith.constant dense<0xFF800000> : vector<8xf32>
    %45 = vector.multi_reduction <maximumf>, %44, %cst_19 [1] : vector<8x8xf32> to vector<8xf32>
    %46 = vector.shape_cast %45 : vector<8xf32> to vector<8x1xf32>
    %47 = vector.broadcast %46 : vector<8x1xf32> to vector<8x8xf32>
    %48 = arith.subf %44, %47 : vector<8x8xf32>
    %49 = math.exp %48 : vector<8x8xf32>
    %cst_20 = arith.constant dense<0.000000e+00> : vector<8xf32>
    %50 = vector.multi_reduction <add>, %49, %cst_20 [1] : vector<8x8xf32> to vector<8xf32>
    %51 = vector.shape_cast %50 : vector<8xf32> to vector<8x1xf32>
    %52 = arith.truncf %49 : vector<8x8xf32> to vector<8x8xbf16>
    %53 = arith.truncf %37 : vector<8x8xf32> to vector<8x8xbf16>
    %cst_21 = arith.constant dense<0.000000e+00> : vector<8x8xf32>
    %54 = tpu.matmul %52, %53, %cst_21 {dimension_numbers = #tpu.dot_dimension_numbers<[1], [0], [0], [1], [0, 0, 1, 1], [], []>} : vector<8x8xbf16>, vector<8x8xbf16>, vector<8x8xf32> -> vector<8x8xf32>
    %55 = tpu.reciprocal %51 {approx = true} : vector<8x1xf32> -> vector<8x1xf32>
    %56 = vector.broadcast %55 : vector<8x1xf32> to vector<8x8xf32>
    %57 = arith.mulf %54, %56 : vector<8x8xf32>
    %58 = vector.extract_strided_slice %11 {offsets = [0, 16], sizes = [8, 8], strides = [1, 1]} : vector<8x96xf32> to vector<8x8xf32>
    %59 = vector.extract_strided_slice %11 {offsets = [0, 48], sizes = [8, 8], strides = [1, 1]} : vector<8x96xf32> to vector<8x8xf32>
    %60 = vector.extract_strided_slice %11 {offsets = [0, 80], sizes = [8, 8], strides = [1, 1]} : vector<8x96xf32> to vector<8x8xf32>
    %61 = arith.truncf %58 : vector<8x8xf32> to vector<8x8xbf16>
    %62 = arith.truncf %59 : vector<8x8xf32> to vector<8x8xbf16>
    %cst_22 = arith.constant dense<0.000000e+00> : vector<8x8xf32>
    %63 = tpu.matmul %61, %62, %cst_22 {dimension_numbers = #tpu.dot_dimension_numbers<[1], [1], [0], [0], [0, 0, 1, 0], [], []>} : vector<8x8xbf16>, vector<8x8xbf16>, vector<8x8xf32> -> vector<8x8xf32>
    %cst_23 = arith.constant 0.353553385 : f32
    %64 = vector.broadcast %cst_23 : f32 to vector<8x8xf32>
    %65 = arith.mulf %63, %64 : vector<8x8xf32>
    %66 = vector.broadcast %6 : vector<1x8xf32> to vector<8x8xf32>
    %67 = arith.addf %65, %66 : vector<8x8xf32>
    %cst_24 = arith.constant dense<0xFF800000> : vector<8xf32>
    %68 = vector.multi_reduction <maximumf>, %67, %cst_24 [1] : vector<8x8xf32> to vector<8xf32>
    %69 = vector.shape_cast %68 : vector<8xf32> to vector<8x1xf32>
    %70 = vector.broadcast %69 : vector<8x1xf32> to vector<8x8xf32>
    %71 = arith.subf %67, %70 : vector<8x8xf32>
    %72 = math.exp %71 : vector<8x8xf32>
    %cst_25 = arith.constant dense<0.000000e+00> : vector<8xf32>
    %73 = vector.multi_reduction <add>, %72, %cst_25 [1] : vector<8x8xf32> to vector<8xf32>
    %74 = vector.shape_cast %73 : vector<8xf32> to vector<8x1xf32>
    %75 = arith.truncf %72 : vector<8x8xf32> to vector<8x8xbf16>
    %76 = arith.truncf %60 : vector<8x8xf32> to vector<8x8xbf16>
    %cst_26 = arith.constant dense<0.000000e+00> : vector<8x8xf32>
    %77 = tpu.matmul %75, %76, %cst_26 {dimension_numbers = #tpu.dot_dimension_numbers<[1], [0], [0], [1], [0, 0, 1, 1], [], []>} : vector<8x8xbf16>, vector<8x8xbf16>, vector<8x8xf32> -> vector<8x8xf32>
    %78 = tpu.reciprocal %74 {approx = true} : vector<8x1xf32> -> vector<8x1xf32>
    %79 = vector.broadcast %78 : vector<8x1xf32> to vector<8x8xf32>
    %80 = arith.mulf %77, %79 : vector<8x8xf32>
    %81 = vector.extract_strided_slice %11 {offsets = [0, 24], sizes = [8, 8], strides = [1, 1]} : vector<8x96xf32> to vector<8x8xf32>
    %82 = vector.extract_strided_slice %11 {offsets = [0, 56], sizes = [8, 8], strides = [1, 1]} : vector<8x96xf32> to vector<8x8xf32>
    %83 = vector.extract_strided_slice %11 {offsets = [0, 88], sizes = [8, 8], strides = [1, 1]} : vector<8x96xf32> to vector<8x8xf32>
    %84 = arith.truncf %81 : vector<8x8xf32> to vector<8x8xbf16>
    %85 = arith.truncf %82 : vector<8x8xf32> to vector<8x8xbf16>
    %cst_27 = arith.constant dense<0.000000e+00> : vector<8x8xf32>
    %86 = tpu.matmul %84, %85, %cst_27 {dimension_numbers = #tpu.dot_dimension_numbers<[1], [1], [0], [0], [0, 0, 1, 0], [], []>} : vector<8x8xbf16>, vector<8x8xbf16>, vector<8x8xf32> -> vector<8x8xf32>
    %cst_28 = arith.constant 0.353553385 : f32
    %87 = vector.broadcast %cst_28 : f32 to vector<8x8xf32>
    %88 = arith.mulf %86, %87 : vector<8x8xf32>
    %89 = vector.broadcast %6 : vector<1x8xf32> to vector<8x8xf32>
    %90 = arith.addf %88, %89 : vector<8x8xf32>
    %cst_29 = arith.constant dense<0xFF800000> : vector<8xf32>
    %91 = vector.multi_reduction <maximumf>, %90, %cst_29 [1] : vector<8x8xf32> to vector<8xf32>
    %92 = vector.shape_cast %91 : vector<8xf32> to vector<8x1xf32>
    %93 = vector.broadcast %92 : vector<8x1xf32> to vector<8x8xf32>
    %94 = arith.subf %90, %93 : vector<8x8xf32>
    %95 = math.exp %94 : vector<8x8xf32>
    %cst_30 = arith.constant dense<0.000000e+00> : vector<8xf32>
    %96 = vector.multi_reduction <add>, %95, %cst_30 [1] : vector<8x8xf32> to vector<8xf32>
    %97 = vector.shape_cast %96 : vector<8xf32> to vector<8x1xf32>
    %98 = arith.truncf %95 : vector<8x8xf32> to vector<8x8xbf16>
    %99 = arith.truncf %83 : vector<8x8xf32> to vector<8x8xbf16>
    %cst_31 = arith.constant dense<0.000000e+00> : vector<8x8xf32>
    %100 = tpu.matmul %98, %99, %cst_31 {dimension_numbers = #tpu.dot_dimension_numbers<[1], [0], [0], [1], [0, 0, 1, 1], [], []>} : vector<8x8xbf16>, vector<8x8xbf16>, vector<8x8xf32> -> vector<8x8xf32>
    %101 = tpu.reciprocal %97 {approx = true} : vector<8x1xf32> -> vector<8x1xf32>
    %102 = vector.broadcast %101 : vector<8x1xf32> to vector<8x8xf32>
    %103 = arith.mulf %100, %102 : vector<8x8xf32>
    %104 = tpu.concatenate %34, %57, %80, %103 in 1 : vector<8x8xf32>, vector<8x8xf32>, vector<8x8xf32>, vector<8x8xf32> -> vector<8x32xf32>
    %105 = arith.truncf %104 : vector<8x32xf32> to vector<8x32xbf16>
    %c0_32 = arith.constant 0 : index
    %c0_33 = arith.constant 0 : index
    %106 = vector.load %arg5[%c0_32, %c0_33] : memref<32x32xbf16, #tpu.memory_space<vmem>>, vector<32x32xbf16>
    %cst_34 = arith.constant dense<0.000000e+00> : vector<8x32xf32>
    %107 = tpu.matmul %105, %106, %cst_34 {dimension_numbers = #tpu.dot_dimension_numbers<[1], [0], [0], [1], [0, 0, 1, 1], [], []>} : vector<8x32xbf16>, vector<32x32xbf16>, vector<8x32xf32> -> vector<8x32xf32>
    %c0_35 = arith.constant 0 : index
    %c0_36 = arith.constant 0 : index
    %108 = vector.load %arg6[%c0_35, %c0_36] : memref<1x32xf32, #tpu.memory_space<vmem>>, vector<1x32xf32>
    %109 = vector.broadcast %108 : vector<1x32xf32> to vector<8x32xf32>
    %110 = arith.addf %107, %109 : vector<8x32xf32>
    %111 = arith.addf %110, %1 : vector<8x32xf32>
    %c0_37 = arith.constant 0 : index
    %c0_38 = arith.constant 0 : index
    %112 = vector.load %arg7[%c0_37, %c0_38] : memref<1x32xf32, #tpu.memory_space<vmem>>, vector<1x32xf32>
    %c0_39 = arith.constant 0 : index
    %c0_40 = arith.constant 0 : index
    %113 = vector.load %arg8[%c0_39, %c0_40] : memref<1x32xf32, #tpu.memory_space<vmem>>, vector<1x32xf32>
    %cst_41 = arith.constant dense<0.000000e+00> : vector<8xf32>
    %114 = vector.multi_reduction <add>, %111, %cst_41 [1] : vector<8x32xf32> to vector<8xf32>
    %115 = vector.shape_cast %114 : vector<8xf32> to vector<8x1xf32>
    %cst_42 = arith.constant 3.200000e+01 : f32
    %116 = vector.broadcast %cst_42 : f32 to vector<8x1xf32>
    %117 = arith.divf %115, %116 : vector<8x1xf32>
    %118 = vector.broadcast %117 : vector<8x1xf32> to vector<8x32xf32>
    %119 = arith.subf %111, %118 : vector<8x32xf32>
    %120 = arith.mulf %119, %119 : vector<8x32xf32>
    %cst_43 = arith.constant dense<0.000000e+00> : vector<8xf32>
    %121 = vector.multi_reduction <add>, %120, %cst_43 [1] : vector<8x32xf32> to vector<8xf32>
    %122 = vector.shape_cast %121 : vector<8xf32> to vector<8x1xf32>
    %cst_44 = arith.constant 3.200000e+01 : f32
    %123 = vector.broadcast %cst_44 : f32 to vector<8x1xf32>
    %124 = arith.divf %122, %123 : vector<8x1xf32>
    %125 = vector.broadcast %117 : vector<8x1xf32> to vector<8x32xf32>
    %126 = arith.subf %111, %125 : vector<8x32xf32>
    %cst_45 = arith.constant 9.99999996E-13 : f32
    %127 = vector.broadcast %cst_45 : f32 to vector<8x1xf32>
    %128 = arith.addf %124, %127 : vector<8x1xf32>
    %129 = math.rsqrt %128 : vector<8x1xf32>
    %130 = vector.broadcast %129 : vector<8x1xf32> to vector<8x32xf32>
    %131 = arith.mulf %126, %130 : vector<8x32xf32>
    %132 = vector.broadcast %112 : vector<1x32xf32> to vector<8x32xf32>
    %133 = arith.mulf %131, %132 : vector<8x32xf32>
    %134 = vector.broadcast %113 : vector<1x32xf32> to vector<8x32xf32>
    %135 = arith.addf %133, %134 : vector<8x32xf32>
    %136 = arith.truncf %135 : vector<8x32xf32> to vector<8x32xbf16>
    %cst_46 = arith.constant 0.000000e+00 : f32
    %137 = vector.broadcast %cst_46 : f32 to vector<8x32xf32>
    %c0_47 = arith.constant 0 : index
    %c0_48 = arith.constant 0 : index
    %138 = vector.load %arg9[%c0_47, %c0_48] : memref<32x256xbf16, #tpu.memory_space<vmem>>, vector<32x128xbf16>
    %cst_49 = arith.constant dense<0.000000e+00> : vector<8x128xf32>
    %139 = tpu.matmul %136, %138, %cst_49 {dimension_numbers = #tpu.dot_dimension_numbers<[1], [0], [0], [1], [0, 0, 1, 1], [], []>} : vector<8x32xbf16>, vector<32x128xbf16>, vector<8x128xf32> -> vector<8x128xf32>
    %c0_50 = arith.constant 0 : index
    %c0_51 = arith.constant 0 : index
    %140 = vector.load %arg10[%c0_50, %c0_51] : memref<1x256xf32, #tpu.memory_space<vmem>>, vector<1x128xf32>
    %141 = vector.broadcast %140 : vector<1x128xf32> to vector<8x128xf32>
    %142 = arith.addf %139, %141 : vector<8x128xf32>
    %cst_52 = arith.constant 5.000000e-01 : f32
    %143 = vector.broadcast %cst_52 : f32 to vector<8x128xf32>
    %144 = arith.mulf %143, %142 : vector<8x128xf32>
    %cst_53 = arith.constant 0.707106769 : f32
    %145 = vector.broadcast %cst_53 : f32 to vector<8x128xf32>
    %146 = arith.mulf %142, %145 : vector<8x128xf32>
    %147 = math.erf %146 : vector<8x128xf32>
    %cst_54 = arith.constant 1.000000e+00 : f32
    %148 = vector.broadcast %cst_54 : f32 to vector<8x128xf32>
    %149 = arith.addf %148, %147 : vector<8x128xf32>
    %150 = arith.mulf %144, %149 : vector<8x128xf32>
    %151 = arith.truncf %150 : vector<8x128xf32> to vector<8x128xbf16>
    %c0_55 = arith.constant 0 : index
    %c0_56 = arith.constant 0 : index
    %152 = vector.load %arg11[%c0_55, %c0_56] : memref<256x32xbf16, #tpu.memory_space<vmem>>, vector<128x32xbf16>
    %cst_57 = arith.constant dense<0.000000e+00> : vector<8x32xf32>
    %153 = tpu.matmul %151, %152, %cst_57 {dimension_numbers = #tpu.dot_dimension_numbers<[1], [0], [0], [1], [0, 0, 1, 1], [], []>} : vector<8x128xbf16>, vector<128x32xbf16>, vector<8x32xf32> -> vector<8x32xf32>
    %154 = arith.addf %137, %153 : vector<8x32xf32>
    %c0_58 = arith.constant 0 : index
    %c128 = arith.constant 128 : index
    %155 = vector.load %arg9[%c0_58, %c128] : memref<32x256xbf16, #tpu.memory_space<vmem>>, vector<32x128xbf16>
    %cst_59 = arith.constant dense<0.000000e+00> : vector<8x128xf32>
    %156 = tpu.matmul %136, %155, %cst_59 {dimension_numbers = #tpu.dot_dimension_numbers<[1], [0], [0], [1], [0, 0, 1, 1], [], []>} : vector<8x32xbf16>, vector<32x128xbf16>, vector<8x128xf32> -> vector<8x128xf32>
    %c0_60 = arith.constant 0 : index
    %c128_61 = arith.constant 128 : index
    %157 = vector.load %arg10[%c0_60, %c128_61] : memref<1x256xf32, #tpu.memory_space<vmem>>, vector<1x128xf32>
    %158 = vector.broadcast %157 : vector<1x128xf32> to vector<8x128xf32>
    %159 = arith.addf %156, %158 : vector<8x128xf32>
    %cst_62 = arith.constant 5.000000e-01 : f32
    %160 = vector.broadcast %cst_62 : f32 to vector<8x128xf32>
    %161 = arith.mulf %160, %159 : vector<8x128xf32>
    %cst_63 = arith.constant 0.707106769 : f32
    %162 = vector.broadcast %cst_63 : f32 to vector<8x128xf32>
    %163 = arith.mulf %159, %162 : vector<8x128xf32>
    %164 = math.erf %163 : vector<8x128xf32>
    %cst_64 = arith.constant 1.000000e+00 : f32
    %165 = vector.broadcast %cst_64 : f32 to vector<8x128xf32>
    %166 = arith.addf %165, %164 : vector<8x128xf32>
    %167 = arith.mulf %161, %166 : vector<8x128xf32>
    %168 = arith.truncf %167 : vector<8x128xf32> to vector<8x128xbf16>
    %c128_65 = arith.constant 128 : index
    %c0_66 = arith.constant 0 : index
    %169 = vector.load %arg11[%c128_65, %c0_66] : memref<256x32xbf16, #tpu.memory_space<vmem>>, vector<128x32xbf16>
    %cst_67 = arith.constant dense<0.000000e+00> : vector<8x32xf32>
    %170 = tpu.matmul %168, %169, %cst_67 {dimension_numbers = #tpu.dot_dimension_numbers<[1], [0], [0], [1], [0, 0, 1, 1], [], []>} : vector<8x128xbf16>, vector<128x32xbf16>, vector<8x32xf32> -> vector<8x32xf32>
    %171 = arith.addf %154, %170 : vector<8x32xf32>
    %c0_68 = arith.constant 0 : index
    %c0_69 = arith.constant 0 : index
    %172 = vector.load %arg12[%c0_68, %c0_69] : memref<1x32xf32, #tpu.memory_space<vmem>>, vector<1x32xf32>
    %173 = vector.broadcast %172 : vector<1x32xf32> to vector<8x32xf32>
    %174 = arith.addf %171, %173 : vector<8x32xf32>
    %175 = arith.addf %174, %135 : vector<8x32xf32>
    %c0_70 = arith.constant 0 : index
    %c0_71 = arith.constant 0 : index
    %176 = vector.load %arg13[%c0_70, %c0_71] : memref<1x32xf32, #tpu.memory_space<vmem>>, vector<1x32xf32>
    %c0_72 = arith.constant 0 : index
    %c0_73 = arith.constant 0 : index
    %177 = vector.load %arg14[%c0_72, %c0_73] : memref<1x32xf32, #tpu.memory_space<vmem>>, vector<1x32xf32>
    %cst_74 = arith.constant dense<0.000000e+00> : vector<8xf32>
    %178 = vector.multi_reduction <add>, %175, %cst_74 [1] : vector<8x32xf32> to vector<8xf32>
    %179 = vector.shape_cast %178 : vector<8xf32> to vector<8x1xf32>
    %cst_75 = arith.constant 3.200000e+01 : f32
    %180 = vector.broadcast %cst_75 : f32 to vector<8x1xf32>
    %181 = arith.divf %179, %180 : vector<8x1xf32>
    %182 = vector.broadcast %181 : vector<8x1xf32> to vector<8x32xf32>
    %183 = arith.subf %175, %182 : vector<8x32xf32>
    %184 = arith.mulf %183, %183 : vector<8x32xf32>
    %cst_76 = arith.constant dense<0.000000e+00> : vector<8xf32>
    %185 = vector.multi_reduction <add>, %184, %cst_76 [1] : vector<8x32xf32> to vector<8xf32>
    %186 = vector.shape_cast %185 : vector<8xf32> to vector<8x1xf32>
    %cst_77 = arith.constant 3.200000e+01 : f32
    %187 = vector.broadcast %cst_77 : f32 to vector<8x1xf32>
    %188 = arith.divf %186, %187 : vector<8x1xf32>
    %189 = vector.broadcast %181 : vector<8x1xf32> to vector<8x32xf32>
    %190 = arith.subf %175, %189 : vector<8x32xf32>
    %cst_78 = arith.constant 9.99999996E-13 : f32
    %191 = vector.broadcast %cst_78 : f32 to vector<8x1xf32>
    %192 = arith.addf %188, %191 : vector<8x1xf32>
    %193 = math.rsqrt %192 : vector<8x1xf32>
    %194 = vector.broadcast %193 : vector<8x1xf32> to vector<8x32xf32>
    %195 = arith.mulf %190, %194 : vector<8x32xf32>
    %196 = vector.broadcast %176 : vector<1x32xf32> to vector<8x32xf32>
    %197 = arith.mulf %195, %196 : vector<8x32xf32>
    %198 = vector.broadcast %177 : vector<1x32xf32> to vector<8x32xf32>
    %199 = arith.addf %197, %198 : vector<8x32xf32>
    %c0_79 = arith.constant 0 : index
    %c0_80 = arith.constant 0 : index
    %c0_81 = arith.constant 0 : index
    %200 = vector.load %arg15[%c0_79, %c0_80, %c0_81] : memref<1x8x32xf32, #tpu.memory_space<vmem>>, vector<1x8x32xf32>
    %201 = vector.shape_cast %200 : vector<1x8x32xf32> to vector<8x32xf32>
    %202 = vector.shape_cast %199 : vector<8x32xf32> to vector<1x8x32xf32>
    tpu.vector_store %arg15[%c0_79, %c0_80, %c0_81], %202 {strides = array<i32>} : memref<1x8x32xf32, #tpu.memory_space<vmem>>, vector<1x8x32xf32>,
    return
  }
  func.func @transform_0(%arg0: i32) -> (i32, i32, i32) {
    %c0_i32 = arith.constant 0 : i32
    %c0_i32_0 = arith.constant 0 : i32
    %c0_i32_1 = arith.constant 0 : i32
    return %arg0, %c0_i32, %c0_i32_0 : i32, i32, i32
  }
  func.func @transform_1(%arg0: i32) -> (i32, i32, i32) {
    %c0_i32 = arith.constant 0 : i32
    %c0_i32_0 = arith.constant 0 : i32
    %c0_i32_1 = arith.constant 0 : i32
    return %arg0, %c0_i32, %c0_i32_0 : i32, i32, i32
  }
  func.func @transform_2(%arg0: i32) -> (i32, i32) {
    %c0_i32 = arith.constant 0 : i32
    %c0_i32_0 = arith.constant 0 : i32
    %c0_i32_1 = arith.constant 0 : i32
    return %c0_i32, %c0_i32_0 : i32, i32
  }
  func.func @transform_3(%arg0: i32) -> (i32, i32) {
    %c0_i32 = arith.constant 0 : i32
    %c0_i32_0 = arith.constant 0 : i32
    %c0_i32_1 = arith.constant 0 : i32
    return %c0_i32, %c0_i32_0 : i32, i32
  }
  func.func @transform_4(%arg0: i32) -> (i32, i32) {
    %c0_i32 = arith.constant 0 : i32
    %c0_i32_0 = arith.constant 0 : i32
    %c0_i32_1 = arith.constant 0 : i32
    return %c0_i32, %c0_i32_0 : i32, i32
  }
  func.func @transform_5(%arg0: i32) -> (i32, i32) {
    %c0_i32 = arith.constant 0 : i32
    %c0_i32_0 = arith.constant 0 : i32
    %c0_i32_1 = arith.constant 0 : i32
    return %c0_i32, %c0_i32_0 : i32, i32
  }
  func.func @transform_6(%arg0: i32) -> (i32, i32) {
    %c0_i32 = arith.constant 0 : i32
    %c0_i32_0 = arith.constant 0 : i32
    %c0_i32_1 = arith.constant 0 : i32
    return %c0_i32, %c0_i32_0 : i32, i32
  }
  func.func @transform_7(%arg0: i32) -> (i32, i32) {
    %c0_i32 = arith.constant 0 : i32
    %c0_i32_0 = arith.constant 0 : i32
    %c0_i32_1 = arith.constant 0 : i32
    return %c0_i32, %c0_i32_0 : i32, i32
  }
  func.func @transform_8(%arg0: i32) -> (i32, i32) {
    %c0_i32 = arith.constant 0 : i32
    %c0_i32_0 = arith.constant 0 : i32
    %c0_i32_1 = arith.constant 0 : i32
    return %c0_i32, %c0_i32_0 : i32, i32
  }
  func.func @transform_9(%arg0: i32) -> (i32, i32) {
    %c0_i32 = arith.constant 0 : i32
    %c0_i32_0 = arith.constant 0 : i32
    %c0_i32_1 = arith.constant 0 : i32
    return %c0_i32, %c0_i32_0 : i32, i32
  }
  func.func @transform_10(%arg0: i32) -> (i32, i32) {
    %c0_i32 = arith.constant 0 : i32
    %c0_i32_0 = arith.constant 0 : i32
    %c0_i32_1 = arith.constant 0 : i32
    return %c0_i32, %c0_i32_0 : i32, i32
  }
  func.func @transform_11(%arg0: i32) -> (i32, i32) {
    %c0_i32 = arith.constant 0 : i32
    %c0_i32_0 = arith.constant 0 : i32
    %c0_i32_1 = arith.constant 0 : i32
    return %c0_i32, %c0_i32_0 : i32, i32
  }
  func.func @transform_12(%arg0: i32) -> (i32, i32) {
    %c0_i32 = arith.constant 0 : i32
    %c0_i32_0 = arith.constant 0 : i32
    %c0_i32_1 = arith.constant 0 : i32
    return %c0_i32, %c0_i32_0 : i32, i32
  }
  func.func @transform_13(%arg0: i32) -> (i32, i32) {
    %c0_i32 = arith.constant 0 : i32
    %c0_i32_0 = arith.constant 0 : i32
    %c0_i32_1 = arith.constant 0 : i32
    return %c0_i32, %c0_i32_0 : i32, i32
  }
  func.func @transform_14(%arg0: i32) -> (i32, i32, i32) {
    %c0_i32 = arith.constant 0 : i32
    %c0_i32_0 = arith.constant 0 : i32
    %c0_i32_1 = arith.constant 0 : i32
    return %arg0, %c0_i32, %c0_i32_0 : i32, i32, i32
  }
}

</mosaic_0001>

<bundles_post_ra>
// kernel: bert_layer.1
= control target key start
LH: loop header
LB: loop body
LE: loop exit
PB: predicated region body
PF: predicated region fallthrough
CT: control target
= control target key end

     0   :  { %s2395_s0 = inlined_call_operand.vmem [shape: f32[2,8,32], index: 0, kind: input, shape index: {}]   ;;  %s2396_s1 = inlined_call_operand.vmem [shape: f32[2,1,8], index: 1, kind: input, shape index: {}]   ;;  %s2397_s2 = inlined_call_operand.vmem [shape: bf16[32,96], index: 2, kind: input, shape index: {}]   ;;  %s2398_s3 = inlined_call_operand.vmem [shape: f32[1,96], index: 3, kind: input, shape index: {}]   ;;  %s2399_s4 = inlined_call_operand.vmem [shape: bf16[32,32], index: 4, kind: input, shape index: {}]   ;;  %s2400_s5 = inlined_call_operand.vmem [shape: f32[1,32], index: 5, kind: input, shape index: {}]   ;;  %s2401_s6 = inlined_call_operand.vmem [shape: f32[1,32], index: 6, kind: input, shape index: {}]   ;;  %s2402_s7 = inlined_call_operand.vmem [shape: f32[1,32], index: 7, kind: input, shape index: {}]   ;;  %s2403_s8 = inlined_call_operand.vmem [shape: bf16[32,256], index: 8, kind: input, shape index: {}]   ;;  %s2404_s9 = inlined_call_operand.vmem [shape: f32[1,256], index: 9, kind: input, shape index: {}]   ;;  %s2405_s10 = inlined_call_operand.vmem [shape: bf16[256,32], index: 10, kind: input, shape index: {}]   ;;  %s2406_s11 = inlined_call_operand.vmem [shape: f32[1,32], index: 11, kind: input, shape index: {}]   ;;  %s2407_s12 = inlined_call_operand.vmem [shape: f32[1,32], index: 12, kind: input, shape index: {}]   ;;  %s2408_s13 = inlined_call_operand.vmem [shape: f32[1,32], index: 13, kind: input, shape index: {}]   ;;  %s2409_s14 = inlined_call_operand.hbm [shape: f32[2,8,32], index: 14, kind: output, shape index: {}]  }
   0x1   :  { %2410 = sst [smem:[#allocation5_spill]] %s2395_s0 }
   0x2   :  { %2411 = sst [smem:[#allocation6_spill]] %s2396_s1 }
   0x3   :  { %2412 = sst [smem:[#allocation7_spill]] %s2397_s2 }
   0x4   :  { %2413 = sst [smem:[#allocation8_spill]] %s2398_s3 }
   0x5   :  { %2414 = sst [smem:[#allocation9_spill]] %s2399_s4 }
   0x6   :  { %19 = vsyncpa [#allocation3], 0 }
   0x7   :  { %21 = vsyncpa [#allocation3 + $0x1], 0  ;;  %s2071_s29 = smov 0   ;;  %s2073_s30 = smov 0  }
   0x8   :  { %s2075_s15 = smov 0   ;;  %s2077_s16 = smov 0  }
   0x9 LB: > { %s2092_s17 = sadd.s32 4294967295, %s1977_s16   ;;  %s1590_s18 = sadd.s32 4294967294, %s1977_s16   ;;  %s1977_s16 = sphi %s2077_s16, %s2425_s16   ;;  %s1973_s15 = sphi %s2075_s15, %s2424_s15   ;;  %s1969_s30 = sphi %s2073_s30, %s2423_s30   ;;  %s1965_s29 = sphi %s2071_s29, %s2422_s29  }
   0xa   : > { %s2096_s19 = sadd.s32 1, %s1977_s16   ;;  %s338_s20 = sadd.s32 1, %s1973_s15 }
   0xb   : > { %s335_s21 = ssub.s32 %s1977_s16, %s2096_s19  ;;  %p348_p0 = scmp.ne.s32.totalorder %s1973_s15, %s1969_s30 }
   0xc   : > { %p336_p1 = scmp.eq.s32.totalorder %s335_s21, 0  ;;  %p349_p2 = scmp.eq.s32.totalorder %s2092_s17, 1 }
   0xd   : > { %p354_p3 = scmp.ne.s32.totalorder %s1969_s30, %s1965_s29  ;;  %p355_p4 = scmp.eq.s32.totalorder %s1590_s18, 1 }
   0xe   : > { %s2107_s22 = scalar_select %p336_p1, %s1973_s15, %s338_s20  }
   0xf   : > { %p2109_p5 = por %p349_p2, %p348_p0  ;;  %p2113_p6 = por %p355_p4, %p354_p3 }
  0x10   : > { %p1593_p7 = scmp.ge.s32.totalorder %s1977_s16, 1  ;;  %p422_p8 = scmp.lt.s32.totalorder %s1977_s16, 3 }
  0x12   : > { %p423_p9 = pnand %p1593_p7, %p422_p8 }
  0x13   : > { %s2417_s2 = sld [smem:[#allocation7_spill]] (!%p423_p9)  ;;  %v1979_v1 = vmov (!%p423_p9), 0.0   ;;  %vm1980_vm0 = vmmov (!%p423_p9), 0   ;;  %p470_p10 = scmp.lt.s32.totalorder (!%p423_p9), %s2092_s17, 1  ;;  %vm504_vm1 = vcmask (!%p423_p9), 261120   ;;  %vm552_vm2 = vcmask (!%p423_p9), 64512  }
  0x14   : > { %426 = sbr.rel (%p423_p9) target bundleno = 2444 (0x98c), region = 76  ;;  %1692 = vmatprep.subr.bf16.mxu0 (!%p423_p9), %v1979_v1  ;;  %1700 = vmatprep.subr.bf16.mxu1 (!%p423_p9), %v1979_v1  ;;  %s2418_s0 = sld [smem:[#allocation5_spill]] (!%p423_p9)  ;;  %vm622_vm3 = vcmask (!%p423_p9), 1043456   ;;  %vm1017_vm4 = vcmask (!%p423_p9), 130048   ;;  %vm1019_vm5 = vcmask (!%p423_p9), 195584  }
  0x15   : > { %1696 = vmatprep.mubr.msk.bf16.mxu0 (!%p423_p9), %vm1980_vm0, %v1979_v1  ;;  %1702 = vmatprep.mubr.msk.bf16.mxu1 (!%p423_p9), %vm1980_vm0, %v1979_v1  ;;  %s2419_s3 = sld [smem:[#allocation8_spill]] (!%p423_p9)  ;;  %s1982_s21 = smov (!%p423_p9), 96  }
  0x16   : > { %s1983_s25 = smov (!%p423_p9), 80   ;;  %s1985_s27 = smov (!%p423_p9), 72  }
  0x17   : > { %s1986_s28 = smov (!%p423_p9), 112   ;;  %s2420_s1 = sld [smem:[#allocation6_spill]] (!%p423_p9) }
  0x18   : > { %s2421_s4 = sld [smem:[#allocation9_spill]] (!%p423_p9) }
  0x19   : > { %v1867_v0 = vld [vmem:[%s2417_s2] sm:$0xff] (!%p423_p9)   ;;  %v1868_v2 = vld [vmem:[%s2417_s2 + $0x8] sm:$0xff] (!%p423_p9)  }
  0x1a   : > { %1693 = vmatpush3.bf16.msra.mxu0 (!%p423_p9), %v1867_v0 }
  0x1b   : > { %1694 = vmatprep.subr.bf16.mxu0 %v1979_v1  ;;  %s2134_s18 = scalar_select %p470_p10, %s2092_s17, 1  ;;  %v1596_v5 = vld [vmem:[%s2419_s3] ss:$0 sm:$0xff] }
  0x1d   : > { %s1595_s20 = sshll.u32 %s2134_s18, 3 }
  0x1e   : > { %1695 = vmatpush3.bf16.msra.mxu0 %v1868_v2  ;;  %s473_s26 = scalar_lea.vmem %s2418_s0, %s1595_s20  ;;  %s1981_s20 = smov 120  }
  0x1f   : > { %1706 = vmatprep.subr.bf16.mxu0 %v1979_v1  ;;  %v2141_v3 = vld [vmem:[%s473_s26] sm:$0xff]  ;;  %s1984_s26 = smov 88   ;;  %s1987_s0 = smov 104  }
  0x20   : > { %v479_v4 = vpack.c.bf16 %v2141_v3, %v2141_v3 }
  0x22   : > { %1697 = vmatmul.mubr.msk.bf16.vlgmr.msra.gmra.mrb[0].mxu0 %vm504_vm1, %v479_v4 }
  0x23   : > { %1708 = vmatprep.mubr.msk.bf16.mxu0 %vm1980_vm0, %v1979_v1 }
  0xf5   : > { %v542_v6 = vpop.f32.mrb[0].mxu0 }
  0xf6   : > { %v543_v7 = vadd.f32 %v1596_v5, %v542_v6  ;;  %v1698_v8 = vpop.f32.mrb[1].mxu0 }
  0xf7   : > { %v545_v9 = vpop.f32.mrb[2].mxu0 }
  0xf8   : > { %v2151_v10 = vpack.c.bf16 %v543_v7, %v543_v7  ;;  %v1699_v11 = vpop.f32.mrb[3].mxu0 }
  0xfa   : > { %668 = vrot.lane.b32.xlu1 %v2151_v10, %s1981_s20  ;;  %550 = vrot.lane.b32.xlu0 %v2151_v10, %s1982_s21  ;;  %s476_s21 = scalar_lea.vmem %s2420_s1, %s2134_s18  ;;  %s1988_s18 = smov 56  }
  0xfb   : > { %v1601_v24 = vld [vmem:[%s476_s21] ss:$0 sm:$0xff]  ;;  %s467_s21 = sand.u32 1, %s1969_s30  }
  0xfe   : > { %782 = vrot.lane.b32.xlu1 %v2151_v10, %s1983_s25  ;;  %670 = vrot.lane.b32.xlu0 %v2151_v10, %s1984_s26  ;;  %s1989_s25 = smov 64   ;;  %s1990_s26 = smov 40  }
 0x102   : > { %894 = vrot.lane.b32.xlu1 %v2151_v10, %s1985_s27  ;;  %780 = vrot.lane.b32.xlu0 %v2151_v10, %s1986_s28  ;;  %s1991_s27 = smov 48   ;;  %s1992_s28 = smov 8  }
 0x106   : > { %892 = vrot.lane.b32.xlu0 %v2151_v10, %s1987_s0  ;;  %s1643_s0 = sshll.u32 %s2092_s17, 7  ;;  %s1995_s17 = smov [#allocation2]  }
 0x16c   : > { %v551_v12 = vpop.permute.xlu0 %550  ;;  %v669_v15 = vpop.permute.xlu1 %668 }
 0x16d   : > { %v557_v13 = vsel %vm552_vm2, %v551_v12, 0 }
 0x16e   : > { %1701 = vmatpush3.bf16.xpose.msra.mxu1 %v557_v13 }
 0x16f   : > { %1712 = vmatprep.subr.bf16.mxu1 %v1979_v1 }
 0x170   : > { %v671_v14 = vpop.permute.xlu0 %670  ;;  %v783_v17 = vpop.permute.xlu1 %782 }
 0x171   : > { %v676_v16 = vsel %vm552_vm2, %v671_v14, 0  ;;  %v788_v18 = vsel %vm552_vm2, %v783_v17, 0 }
 0x174   : > { %v895_v19 = vpop.permute.xlu1 %894  ;;  %v781_v20 = vpop.permute.xlu0 %780 }
 0x175   : > { %1703 = vmatmul.mubr.msk.bf16.vlgmr.msra.gmra.mrb[0].mxu1 %vm552_vm2, %v2151_v10  ;;  %v900_v21 = vsel %vm552_vm2, %v895_v19, 0 }
 0x176   : > { %1713 = vmatpush3.bf16.xpose.msra.mxu1 %v676_v16  ;;  %1714 = vmatprep.mubr.msk.bf16.mxu1 %vm1980_vm0, %v1979_v1 }
 0x177   : > { %1724 = vmatprep.subr.bf16.mxu1 %v1979_v1 }
 0x178   : > { %v893_v22 = vpop.permute.xlu0 %892 }
 0x17d   : > { %1715 = vmatmul.mubr.msk.bf16.vlgmr.msra.gmra.mrb[4].mxu1 %vm552_vm2, %v669_v15 }
 0x17e   : > { %1725 = vmatpush3.bf16.xpose.msra.mxu1 %v788_v18  ;;  %1726 = vmatprep.mubr.msk.bf16.mxu1 %vm1980_vm0, %v1979_v1 }
 0x17f   : > { %1736 = vmatprep.subr.bf16.mxu1 %v1979_v1 }
 0x185   : > { %1727 = vmatmul.mubr.msk.bf16.vlgmr.msra.gmra.mrb[8].mxu1 %vm552_vm2, %v781_v20 }
 0x186   : > { %1737 = vmatpush3.bf16.xpose.msra.mxu1 %v900_v21  ;;  %1738 = vmatprep.mubr.msk.bf16.mxu1 %vm1980_vm0, %v1979_v1 }
 0x187   : > { %1748 = vmatprep.subr.bf16.mxu1 %v1979_v1 }
 0x18d   : > { %1739 = vmatmul.mubr.msk.bf16.vlgmr.msra.gmra.mrb[12].mxu1 %vm552_vm2, %v893_v22 }
 0x18e   : > { %1752 = vmatprep.mubr.msk.bf16.mxu1 %vm1980_vm0, %v1979_v1 }
 0x248   : > { %v593_v23 = vpop.f32.mrb[0].mxu1 }
 0x249   : > { %v599_v25 = vmul.f32 0.35355338, %v593_v23  ;;  %v1704_v26 = vpop.f32.mrb[1].mxu1 }
 0x24a   : > { %v596_v27 = vpop.f32.mrb[2].mxu1 }
 0x24b   : > { %v1705_v28 = vpop.f32.mrb[3].mxu1  ;;  %v606_v29 = vadd.f32 %v1601_v24, %v599_v25 }
 0x24d   : > { %v607_v30 = vsel %vm552_vm2, %v606_v29, -inf }
 0x24e   : > { %608 = vmax.xlane.f32.xlu1 %v607_v30 }
 0x250   : > { %v712_v31 = vpop.f32.mrb[4].mxu1 }
 0x251   : > { %v718_v32 = vmul.f32 0.35355338, %v712_v31  ;;  %v1716_v33 = vpop.f32.mrb[5].mxu1 }
 0x252   : > { %v715_v34 = vpop.f32.mrb[6].mxu1 }
 0x253   : > { %v1717_v35 = vpop.f32.mrb[7].mxu1  ;;  %v719_v36 = vadd.f32 %v1601_v24, %v718_v32  ;;  %v1869_v34 = vld [vmem:[%s2421_s4] sm:$0xff]  }
 0x254   : > { %1749 = vmatpush3.bf16.msra.mxu1 %v1869_v34  ;;  %v1886_v34 = vld [vmem:[%s2405_s10 + $0x28] sm:$0xff]  }
 0x255   : > { %v720_v37 = vsel %vm552_vm2, %v719_v36, -inf  ;;  %1750 = vmatprep.subr.bf16.mxu1 %v1979_v1 }
 0x256   : > { %721 = vmax.xlane.f32.xlu0 %v720_v37 }
 0x258   : > { %v824_v38 = vpop.f32.mrb[8].mxu1 }
 0x259   : > { %v830_v39 = vmul.f32 0.35355338, %v824_v38  ;;  %v1728_v40 = vpop.f32.mrb[9].mxu1 }
 0x25a   : > { %v827_v41 = vpop.f32.mrb[10].mxu1 }
 0x25b   : > { %v1729_v42 = vpop.f32.mrb[11].mxu1  ;;  %v831_v43 = vadd.f32 %v1601_v24, %v830_v39 }
 0x25d   : > { %v832_v44 = vsel %vm552_vm2, %v831_v43, -inf }
 0x25e   : > { %833 = vmax.xlane.f32.xlu0 %v832_v44 }
 0x25f   : > { %730 = vrot.lane.b32.xlu1 %v2151_v10, %s1988_s18  ;;  %s1594_s18 = sshll.u32 %s467_s21, 3 }
 0x260   : > { %v936_v45 = vpop.f32.mrb[12].mxu1  ;;  %s469_s20 = scalar_lea.vmem [#allocation2], %s1594_s18  ;;  %s1919_s18 = sshll.u32 %s1995_s17, 4  ;;  %s1920_s18 = int_to_ptr.vmem [resolvable:$false] %s1919_s18 }
 0x261   : > { %v1740_v46 = vpop.f32.mrb[13].mxu1  ;;  %v942_v49 = vmul.f32 0.35355338, %v936_v45  ;;  %s1522_s1 = sshll.u32 %s469_s20, 4  ;;  %s2354_s1 = int_to_ptr.vmem [resolvable:$true] %s1522_s1 }
 0x262   : > { %v939_v47 = vpop.f32.mrb[14].mxu1  ;;  %p1922_p0 = scmp.lt.s32.totalorder %s2354_s1, %s1920_s18 }
 0x263   : > { %v1741_v48 = vpop.f32.mrb[15].mxu1  ;;  %v943_v50 = vadd.f32 %v1601_v24, %v942_v49 }
 0x265   : > { %v944_v51 = vsel %vm552_vm2, %v943_v50, -inf }
 0x274   : > { %617 = vrot.lane.b32.xlu0 %v2151_v10, %s1989_s25  ;;  %s1993_s25 = smov 16  }
 0x278   : > { %954 = vrot.lane.b32.xlu0 %v2151_v10, %s1990_s26  ;;  %s1994_s26 = smov 24  }
 0x283   : > { %945 = vmax.xlane.f32.xlu1 %v944_v51 }
 0x294   : > { %842 = vrot.lane.b32.xlu1 %v2151_v10, %s1991_s27  ;;  %s1921_s27 = scalar_lea.vmem %s1920_s18, 256 }
 0x2db   : > { %v609_v52 = vpop.xlane.xlu1 %608 }
 0x2dc   : > { %v610_v53 = vsub.f32 %v606_v29, %v609_v52 }
 0x2de   : > { %v611_v54 = vmul.f32 1.442695, %v610_v53 }
 0x2df   : > { %v731_v0 = vpop.permute.xlu1 %730 }
 0x2e0   : > { %1891 = vpow2.f32 %v611_v54  ;;  %v736_v6 = vsel %vm622_vm3, %v731_v0, 0 }
 0x2e3   : > { %v722_v55 = vpop.xlane.xlu0 %721 }
 0x2e4   : > { %v723_v56 = vsub.f32 %v719_v36, %v722_v55  ;;  %v1870_v36 = vld [vmem:[%s2421_s4 + $0x8] sm:$0xff]   ;;  %s2352_s4 = scalar_lea.hbm %s2409_s14, %s1643_s0 }
 0x2e5   : > { %1751 = vmatpush3.bf16.msra.mxu1 %v1870_v36  ;;  %v1888_v36 = vld [vmem:[%s2405_s10 + $0x30] sm:$0xff]  }
 0x2e6   : > { %v724_v57 = vmul.f32 1.442695, %v723_v56  ;;  %1764 = vmatprep.subr.bf16.mxu1 %v1979_v1 }
 0x2e8   : > { %1893 = vpow2.f32 %v724_v57 }
 0x2ea   : > { %v1892_v61 = vpop.eup %1891 }
 0x2eb   : > { %v834_v58 = vpop.xlane.xlu0 %833  ;;  %v616_v4 = vpack.c.bf16 %v1892_v61, %v1892_v61  ;;  %v613_v7 = vsel %vm552_vm2, %v1892_v61, 0.0 }
 0x2ec   : > { %v835_v59 = vsub.f32 %v831_v43, %v834_v58 }
 0x2ee   : > { %v836_v60 = vmul.f32 1.442695, %v835_v59  ;;  %v1609_v59 = vld [vmem:[%s2400_s5] ss:$0 sm:$0xff] }
 0x2ef   : > { %v618_v62 = vpop.permute.xlu0 %617 }
 0x2f0   : > { %1895 = vpow2.f32 %v836_v60  ;;  %v624_v63 = vsel %vm622_vm3, %v618_v62, 0 }
 0x2f1   : > { %1707 = vmatpush3.bf16.msra.mxu0 %v624_v63 }
 0x2f2   : > { %v1894_v2 = vpop.eup %1893  ;;  %1718 = vmatprep.subr.bf16.mxu0 %v1979_v1 }
 0x2f3   : > { %v726_v5 = vsel %vm552_vm2, %v1894_v2, 0.0  ;;  %v729_v9 = vpack.c.bf16 %v1894_v2, %v1894_v2  ;;  %v955_v16 = vpop.permute.xlu0 %954 }
 0x2f4   : > { %727 = vadd.xlane.f32.xlu1 %v726_v5  ;;  %1709 = vmatmul.mubr.msk.bf16.vlgmr.msra.gmra.mrb[4].mxu0 %vm552_vm2, %v616_v4  ;;  %v960_v18 = vsel %vm622_vm3, %v955_v16, 0 }
 0x2f5   : > { %1719 = vmatpush3.bf16.msra.mxu0 %v736_v6  ;;  %1720 = vmatprep.mubr.msk.bf16.mxu0 %vm1980_vm0, %v1979_v1 }
 0x2f6   : > { %1730 = vmatprep.subr.bf16.mxu0 %v1979_v1 }
 0x2f8   : > { %614 = vadd.xlane.f32.xlu1 %v613_v7 }
 0x2fa   : > { %v1896_v8 = vpop.eup %1895 }
 0x2fb   : > { %v838_v10 = vsel %vm552_vm2, %v1896_v8, 0.0  ;;  %v841_v17 = vpack.c.bf16 %v1896_v8, %v1896_v8 }
 0x2fc   : > { %839 = vadd.xlane.f32.xlu0 %v838_v10  ;;  %1721 = vmatmul.mubr.msk.bf16.vlgmr.msra.gmra.mrb[8].mxu0 %vm552_vm2, %v729_v9  ;;  %v1871_v10 = vld [vmem:[%s2403_s8] ss:$8 sps:$4 sm:$0xff]  }
 0x2fd   : > { %1732 = vmatprep.mubr.msk.bf16.mxu0 %vm1980_vm0, %v1979_v1 }
 0x310   : > { %v946_v11 = vpop.xlane.xlu1 %945 }
 0x311   : > { %v947_v12 = vsub.f32 %v943_v50, %v946_v11  ;;  %v1872_v11 = vld [vmem:[%s2403_s8 + $0x4] ss:$8 sps:$4 sm:$0xff]  }
 0x313   : > { %v948_v13 = vmul.f32 1.442695, %v947_v12  ;;  %v1874_v12 = vld [vmem:[%s2403_s8 + $0x14] ss:$8 sps:$4 sm:$0xff]  }
 0x314   : > { %v843_v14 = vpop.permute.xlu1 %842 }
 0x315   : > { %1897 = vpow2.f32 %v948_v13  ;;  %v848_v15 = vsel %vm622_vm3, %v843_v14, 0 }
 0x316   : > { %1731 = vmatpush3.bf16.msra.mxu0 %v848_v15 }
 0x317   : > { %1742 = vmatprep.subr.bf16.mxu0 %v1979_v1 }
 0x319   : > { %1733 = vmatmul.mubr.msk.bf16.vlgmr.msra.gmra.mrb[12].mxu0 %vm552_vm2, %v841_v17  ;;  %v1613_v17 = vld [vmem:[%s2401_s6] ss:$0 sm:$0xff] }
 0x31a   : > { %1743 = vmatpush3.bf16.msra.mxu0 %v960_v18  ;;  %1744 = vmatprep.mubr.msk.bf16.mxu0 %vm1980_vm0, %v1979_v1 }
 0x31b   : > { %1756 = vmatprep.subr.bf16.mxu0 %v1979_v1 }
 0x31f   : > { %v1898_v19 = vpop.eup %1897 }
 0x320   : > { %v950_v20 = vsel %vm552_vm2, %v1898_v19, 0.0  ;;  %v953_v21 = vpack.c.bf16 %v1898_v19, %v1898_v19  ;;  %v1614_v19 = vld [vmem:[%s2402_s7] ss:$0 sm:$0xff] }
 0x321   : > { %951 = vadd.xlane.f32.xlu0 %v950_v20 }
 0x322   : > { %1745 = vmatmul.mubr.msk.bf16.vlgmr.msra.gmra.mrb[16].mxu0 %vm552_vm2, %v953_v21 }
 0x323   : > { %1760 = vmatprep.mubr.msk.bf16.mxu0 %vm1980_vm0, %v1979_v1  ;;  %1757 = vmatpush3.bf16.msra.mxu0 %v1871_v10 }
 0x324   : > { %1758 = vmatprep.subr.bf16.mxu0 %v1979_v1 }
 0x381   : > { %v728_v22 = vpop.xlane.xlu1 %727 }
 0x382   : > { %1899 = vrcp.f32 %v728_v22  ;;  %v1875_v22 = vld [vmem:[%s2405_s10 + $0x40] sm:$0xff]  }
 0x385   : > { %v615_v49 = vpop.xlane.xlu1 %614 }
 0x389   : > { %v840_v33 = vpop.xlane.xlu0 %839 }
 0x38a   : > { %1901 = vrcp.f32 %v840_v33  ;;  %v1885_v33 = vld [vmem:[%s2405_s10 + $0x68] sm:$0xff]  }
 0x38c   : > { %v1900_v27 = vpop.eup %1899 }
 0x394   : > { %v1902_v37 = vpop.eup %1901 }
 0x3ae   : > { %v952_v35 = vpop.xlane.xlu0 %951 }
 0x3af   : > { %1903 = vrcp.f32 %v952_v35  ;;  %v1887_v35 = vld [vmem:[%s2405_s10 + $0x70] sm:$0xff]  }
 0x3b0   : > { %1905 = vrcp.f32 %v615_v49 }
 0x3b9   : > { %v1904_v43 = vpop.eup %1903 }
 0x3ba   : > { %v1906_v50 = vpop.eup %1905 }
 0x3c7   : > { %v660_v23 = vpop.f32.mrb[4].mxu0 }
 0x3c8   : > { %v1710_v24 = vpop.f32.mrb[5].mxu0  ;;  %v667_v53 = vmul.f32 %v1906_v50, %v660_v23  ;;  %v1876_v23 = vld [vmem:[%s2405_s10] sm:$0xff]  }
 0x3c9   : > { %v663_v25 = vpop.f32.mrb[6].mxu0 }
 0x3ca   : > { %v1711_v26 = vpop.f32.mrb[7].mxu0  ;;  %v1877_v25 = vld [vmem:[%s2405_s10 + $0x48] sm:$0xff]  }
 0x3cb   : > { %v1878_v26 = vld [vmem:[%s2405_s10 + $0x8] sm:$0xff]  }
 0x3cf   : > { %v772_v28 = vpop.f32.mrb[8].mxu0 }
 0x3d0   : > { %v779_v29 = vmul.f32 %v1900_v27, %v772_v28  ;;  %v1722_v30 = vpop.f32.mrb[9].mxu0  ;;  %v1879_v27 = vld [vmem:[%s2405_s10 + $0x50] sm:$0xff]  }
 0x3d1   : > { %v775_v31 = vpop.f32.mrb[10].mxu0  ;;  %v1880_v28 = vld [vmem:[%s2405_s10 + $0x10] sm:$0xff]   ;;  %v1882_v30 = vld [vmem:[%s2405_s10 + $0x18] sm:$0xff]  }
 0x3d2   : > { %1005 = vrot.lane.b32.xlu0 %v779_v29, %s1992_s28  ;;  %v1723_v32 = vpop.f32.mrb[11].mxu0  ;;  %v1881_v29 = vld [vmem:[%s2405_s10 + $0x58] sm:$0xff]   ;;  %v1883_v31 = vld [vmem:[%s2405_s10 + $0x60] sm:$0xff]  }
 0x3d3   : > { %v1884_v32 = vld [vmem:[%s2405_s10 + $0x20] sm:$0xff]  }
 0x3ec   : > { %v884_v38 = vpop.f32.mrb[12].mxu0 }
 0x3ed   : > { %v891_v39 = vmul.f32 %v1902_v37, %v884_v38  ;;  %v1734_v40 = vpop.f32.mrb[13].mxu0  ;;  %v1889_v37 = vld [vmem:[%s2405_s10 + $0x78] sm:$0xff]  }
 0x3ee   : > { %v887_v41 = vpop.f32.mrb[14].mxu0  ;;  %v1890_v38 = vld [vmem:[%s2405_s10 + $0x38] sm:$0xff]   ;;  %v1619_v40 = vld [vmem:[%s2404_s9 + $0x1] ss:$0 sm:$0xff] }
 0x3ef   : > { %1009 = vrot.lane.b32.xlu1 %v891_v39, %s1993_s25  ;;  %v1735_v42 = vpop.f32.mrb[15].mxu0  ;;  %v1615_v39 = vld [vmem:[%s2404_s9] ss:$0 sm:$0xff]  ;;  %s1509_s25 = scalar_lea.sflag [#allocation3], %s467_s21 }
 0x3f5   : > { %v996_v44 = vpop.f32.mrb[16].mxu0 }
 0x3f6   : > { %v1003_v45 = vmul.f32 %v1904_v43, %v996_v44  ;;  %v1746_v46 = vpop.f32.mrb[17].mxu0 }
 0x3f7   : > { %v999_v47 = vpop.f32.mrb[18].mxu0 }
 0x3f8   : > { %1013 = vrot.lane.b32.xlu1 %v1003_v45, %s1994_s26  ;;  %v1747_v48 = vpop.f32.mrb[19].mxu0  ;;  %s1915_s26 = scalar_lea.vmem %s2354_s1, 128 }
 0x3f9   : > { %p1916_p11 = scmp.ne.s32.totalorder %s2354_s1, %s1915_s26  ;;  %p1923_p1 = scmp.lt.s32.totalorder %s1921_s27, %s1915_s26 }
 0x3fb   : > { %p1917_p12 = pnand %p1916_p11, %p2109_p5  ;;  %p1924_p2 = por %p1923_p1, %p1922_p0 }
 0x3fd   : > { %p1918_p13 = pneg %p1917_p12 }
 0x3ff   : > { %p1925_p3 = pnand %p1924_p2, %p1918_p13 }
 0x444   : > { %v1006_v51 = vpop.permute.xlu0 %1005 }
 0x445   : > { %v1016_v54 = vsel %vm552_vm2, %v667_v53, %v1006_v51 }
 0x461   : > { %v1010_v52 = vpop.permute.xlu1 %1009 }
 0x462   : > { %v1018_v55 = vsel %vm1017_vm4, %v1016_v54, %v1010_v52 }
 0x46a   : > { %v1014_v56 = vpop.permute.xlu1 %1013 }
 0x46b   : > { %v1020_v57 = vsel %vm1019_vm5, %v1018_v55, %v1014_v56 }
 0x46c   : > { %v1021_v58 = vpack.c.bf16 %v1020_v57, %v1020_v57 }
 0x46e   : > { %1753 = vmatmul.mubr.msk.bf16.vlgmr.msra.gmra.mrb[16].mxu1 %vm504_vm1, %v1021_v58 }
 0x46f   : > { %1768 = vmatprep.mubr.msk.bf16.mxu1 %vm1980_vm0, %v1979_v1  ;;  %1765 = vmatpush3.bf16.msra.mxu1 %v1872_v11 }
 0x470   : > { %1766 = vmatprep.subr.bf16.mxu1 %v1979_v1 }
 0x473   : > { %1767 = vmatpush3.bf16.msra.mxu1 %v1874_v12 }
 0x474   : > { %1792 = vmatprep.subr.bf16.mxu1 %v1979_v1 }
 0x541   : > { %v1082_v60 = vpop.f32.mrb[16].mxu1 }
 0x542   : > { %v1083_v61 = vadd.f32 %v1609_v59, %v1082_v60  ;;  %v1754_v62 = vpop.f32.mrb[17].mxu1 }
 0x543   : > { %v1085_v63 = vpop.f32.mrb[18].mxu1 }
 0x544   : > { %v1755_v0 = vpop.f32.mrb[19].mxu1  ;;  %v1088_v2 = vadd.f32 %v1083_v61, %v2141_v3  ;;  %v1873_v3 = vld [vmem:[%s2403_s8 + $0x10] ss:$8 sps:$4 sm:$0xff]  }
 0x545   : > { %1759 = vmatpush3.bf16.msra.mxu0 %v1873_v3  ;;  %v1639_v0 = vld [vmem:[%s2406_s11] ss:$0 sm:$0xff] }
 0x546   : > { %v1091_v4 = vsel %vm504_vm1, %v1088_v2, 0.0  ;;  %1772 = vmatprep.subr.bf16.mxu0 %v1979_v1 }
 0x547   : > { %1092 = vadd.xlane.f32.xlu0 %v1091_v4 }
 0x5d4   : > { %v1093_v5 = vpop.xlane.xlu0 %1092 }
 0x5d5   : > { %v1095_v6 = vmul.f32 0.03125, %v1093_v5 }
 0x5d7   : > { %v1096_v7 = vsub.f32 %v1088_v2, %v1095_v6 }
 0x5d9   : > { %v1097_v8 = vmul.f32 %v1096_v7, %v1096_v7 }
 0x5db   : > { %v1098_v9 = vsel %vm504_vm1, %v1097_v8, 0.0 }
 0x5dc   : > { %1099 = vadd.xlane.f32.xlu1 %v1098_v9 }
 0x669   : > { %v1100_v13 = vpop.xlane.xlu1 %1099 }
 0x66a   : > { %v1101_v14 = vmul.f32 0.03125, %v1100_v13 }
 0x66c   : > { %v1102_v15 = vadd.f32 1e-12, %v1101_v14 }
 0x66e   : > { %1907 = vrsqrt.f32 %v1102_v15 }
 0x678   : > { %v1908_v16 = vpop.eup %1907 }
 0x679   : > { %v1104_v18 = vmul.f32 %v1908_v16, %v1096_v7 }
 0x67b   : > { %v1111_v20 = vmul.f32 %v1613_v17, %v1104_v18 }
 0x67d   : > { %v2257_v21 = vadd.f32 %v1614_v19, %v1111_v20 }
 0x67f   : > { %v1119_v24 = vpack.c.bf16 %v2257_v21, %v2257_v21 }
 0x681   : > { %1761 = vmatmul.mubr.msk.bf16.vlgmr.msra.gmra.mrb[20].mxu0 %vm504_vm1, %v1119_v24  ;;  %1769 = vmatmul.mubr.msk.bf16.vlgmr.msra.gmra.mrb[20].mxu1 %vm504_vm1, %v1119_v24 }
 0x682   : > { %1773 = vmatpush3.bf16.msra.mxu0 %v1875_v22  ;;  %1793 = vmatpush3.bf16.msra.mxu1 %v1876_v23  ;;  %v1641_v23 = vld [vmem:[%s2408_s13] ss:$0 sm:$0xff] }
 0x683   : > { %1774 = vmatprep.subr.bf16.mxu0 %v1979_v1  ;;  %1794 = vmatprep.subr.bf16.mxu1 %v1979_v1 }
 0x684   : > { %1788 = vmatprep.mubr.msk.bf16.mxu0 %vm1980_vm0, %v1979_v1  ;;  %1808 = vmatprep.mubr.msk.bf16.mxu1 %vm1980_vm0, %v1979_v1 }
 0x686   : > { %1775 = vmatpush3.bf16.msra.mxu0 %v1877_v25  ;;  %1795 = vmatpush3.bf16.msra.mxu1 %v1878_v26 }
 0x687   : > { %1776 = vmatprep.subr.bf16.mxu0 %v1979_v1  ;;  %1796 = vmatprep.subr.bf16.mxu1 %v1979_v1 }
 0x68a   : > { %1777 = vmatpush3.bf16.msra.mxu0 %v1879_v27  ;;  %1797 = vmatpush3.bf16.msra.mxu1 %v1880_v28 }
 0x68b   : > { %1778 = vmatprep.subr.bf16.mxu0 %v1979_v1  ;;  %1798 = vmatprep.subr.bf16.mxu1 %v1979_v1 }
 0x68e   : > { %1779 = vmatpush3.bf16.msra.mxu0 %v1881_v29  ;;  %1799 = vmatpush3.bf16.msra.mxu1 %v1882_v30 }
 0x68f   : > { %1780 = vmatprep.subr.bf16.mxu0 %v1979_v1  ;;  %1800 = vmatprep.subr.bf16.mxu1 %v1979_v1 }
 0x692   : > { %1781 = vmatpush3.bf16.msra.mxu0 %v1883_v31  ;;  %1801 = vmatpush3.bf16.msra.mxu1 %v1884_v32 }
 0x693   : > { %1782 = vmatprep.subr.bf16.mxu0 %v1979_v1  ;;  %1802 = vmatprep.subr.bf16.mxu1 %v1979_v1 }
 0x696   : > { %1783 = vmatpush3.bf16.msra.mxu0 %v1885_v33  ;;  %1803 = vmatpush3.bf16.msra.mxu1 %v1886_v34 }
 0x697   : > { %1784 = vmatprep.subr.bf16.mxu0 %v1979_v1  ;;  %1804 = vmatprep.subr.bf16.mxu1 %v1979_v1 }
 0x69a   : > { %1785 = vmatpush3.bf16.msra.mxu0 %v1887_v35  ;;  %1805 = vmatpush3.bf16.msra.mxu1 %v1888_v36 }
 0x69b   : > { %1786 = vmatprep.subr.bf16.mxu0 %v1979_v1  ;;  %1806 = vmatprep.subr.bf16.mxu1 %v1979_v1 }
 0x69e   : > { %1787 = vmatpush3.bf16.msra.mxu0 %v1889_v37  ;;  %1807 = vmatpush3.bf16.msra.mxu1 %v1890_v38 }
 0x754   : > { %v1180_v41 = vpop.f32.mrb[20].mxu0  ;;  %v1265_v1 = vpop.f32.mrb[20].mxu1 }
 0x755   : > { %v1181_v42 = vadd.f32 %v1615_v39, %v1180_v41  ;;  %v1266_v43 = vadd.f32 %v1619_v40, %v1265_v1  ;;  %v1762_v44 = vpop.f32.mrb[21].mxu0  ;;  %v1770_v45 = vpop.f32.mrb[21].mxu1 }
 0x756   : > { %v1183_v46 = vpop.f32.mrb[22].mxu0  ;;  %v1268_v47 = vpop.f32.mrb[22].mxu1 }
 0x757   : > { %v1187_v48 = vmul.f32 0.70710677, %v1181_v42  ;;  %v1272_v49 = vmul.f32 0.70710677, %v1266_v43  ;;  %v1763_v50 = vpop.f32.mrb[23].mxu0  ;;  %v1771_v51 = vpop.f32.mrb[23].mxu1 }
 0x758   : > { %v1186_v54 = vmul.f32 0.5, %v1181_v42  ;;  %v1271_v56 = vmul.f32 0.5, %v1266_v43 }
 0x759   : > { %1909 = verf.f32 %v1187_v48 }
 0x75a   : > { %1911 = verf.f32 %v1272_v49 }
 0x763   : > { %v1910_v52 = vpop.eup %1909 }
 0x764   : > { %v1912_v53 = vpop.eup %1911  ;;  %v1189_v55 = vadd.f32 1.0, %v1910_v52 }
 0x765   : > { %v1274_v57 = vadd.f32 1.0, %v1912_v53 }
 0x766   : > { %v1190_v58 = vmul.f32 %v1189_v55, %v1186_v54 }
 0x767   : > { %v1275_v59 = vmul.f32 %v1274_v57, %v1271_v56 }
 0x768   : > { %v1191_v60 = vpack.c.bf16 %v1190_v58, %v1190_v58 }
 0x769   : > { %v1276_v61 = vpack.c.bf16 %v1275_v59, %v1275_v59 }
 0x76a   : > { %1809 = vmatmul.mubr.bf16.vlgmr.msra.gmra.mrb[24].mxu1 %v1191_v60 }
 0x76b   : > { %1789 = vmatmul.mubr.bf16.vlgmr.msra.gmra.mrb[24].mxu0 %v1276_v61 }
 0x83d   : > { %v1463_v62 = vpop.f32.mrb[24].mxu1 }
 0x83e   : > { %v1375_v63 = vpop.f32.mrb[24].mxu0  ;;  %v1810_v2 = vpop.f32.mrb[25].mxu1 }
 0x83f   : > { %v1464_v4 = vadd.f32 %v1463_v62, %v1375_v63  ;;  %v1790_v5 = vpop.f32.mrb[25].mxu0  ;;  %v1466_v6 = vpop.f32.mrb[26].mxu1 }
 0x840   : > { %v1378_v7 = vpop.f32.mrb[26].mxu0  ;;  %v1811_v8 = vpop.f32.mrb[27].mxu1 }
 0x841   : > { %v1476_v9 = vadd.f32 %v1639_v0, %v1464_v4  ;;  %v1791_v10 = vpop.f32.mrb[27].mxu0 }
 0x843   : > { %v1477_v11 = vadd.f32 %v1476_v9, %v2257_v21  ;;  %v1640_v21 = vld [vmem:[%s2407_s12] ss:$0 sm:$0xff] }
 0x845   : > { %v1480_v3 = vsel %vm504_vm1, %v1477_v11, 0.0 }
 0x846   : > { %1481 = vadd.xlane.f32.xlu0 %v1480_v3 }
 0x8d3   : > { %v1482_v12 = vpop.xlane.xlu0 %1481 }
 0x8d4   : > { %v1483_v13 = vmul.f32 0.03125, %v1482_v12 }
 0x8d6   : > { %v1484_v14 = vsub.f32 %v1477_v11, %v1483_v13 }
 0x8d8   : > { %v1485_v15 = vmul.f32 %v1484_v14, %v1484_v14 }
 0x8da   : > { %v1486_v16 = vsel %vm504_vm1, %v1485_v15, 0.0 }
 0x8db   : > { %1487 = vadd.xlane.f32.xlu0 %v1486_v16 }
 0x968   : > { %v1488_v17 = vpop.xlane.xlu0 %1487 }
 0x969   : > { %v1489_v18 = vmul.f32 0.03125, %v1488_v17 }
 0x96b   : > { %v1490_v19 = vadd.f32 1e-12, %v1489_v18 }
 0x96d   : > { %1913 = vrsqrt.f32 %v1490_v19 }
 0x977   : > { %v1914_v20 = vpop.eup %1913 }
 0x978   : > { %v1492_v22 = vmul.f32 %v1914_v20, %v1484_v14 }
 0x97a   : > { %v1499_v24 = vmul.f32 %v1640_v21, %v1492_v22 }
 0x97c   : > { %v1506_v25 = vadd.f32 %v1641_v23, %v1499_v24 }
 0x97e   : > { %1507 = vst.msk [vmem:[%s469_s20] sm:$0xff] %vm504_vm1, %v1506_v25 }
 0x97f   : > { %1928 = shalt.err (!%p1925_p3)
}
 0x980   : > { %s1929_s2 = scalar_lea.hbm %s2352_s4, 128  ;;  %s1933_s28 = scalar_lea.hbm %s2409_s14, 256 }
 0x981   : > { %p1930_p4 = scmp.ne.s32.totalorder %s2352_s4, %s1929_s2  ;;  %p1934_p9 = scmp.lt.u32.totalorder %s2352_s4, %s2409_s14 }
 0x982   : > { %p1935_p10 = scmp.lt.u32.totalorder %s1933_s28, %s1929_s2  ;;  %p1937_p12 = scmp.lt.u32.totalorder %s1929_s2, %s2352_s4 }
 0x983   : > { %p1931_p7 = pnand %p1930_p4, %p2109_p5 }
 0x984   : > { %p1936_p11 = por %p1935_p10, %p1934_p9 }
 0x985   : > { %p1932_p8 = pneg %p1931_p7 }
 0x986   : > { %p1938_p13 = por %p1937_p12, %p1936_p11 }
 0x988   : > { %p1939_p0 = pnand %p1938_p13, %p1932_p8 }
 0x98a   : > { %1942 = shalt.err (!%p1939_p0)
}
 0x98b   : > { %1812 = dma.vmem_to_hbm [thread:$0]  (%p2109_p5), %s2354_s1, 128, %s2352_s4, %s1509_s25  }
 0x98c PF: > { %p1818_p1 = scmp.ge.s32.totalorder %s1977_s16, 2  ;;  %s1534_s26 = sand.u32 1, %s1965_s29  }
 0x98d   : > { %s1535_s17 = scalar_lea.sflag [#allocation3], %s1534_s26 }
 0x98e   : > { %p1815_p2 = pnand %p1818_p1, %p2113_p6 }
 0x990   : > { %1960 = dma.done.wait (!%p1815_p2), %s1535_s17, 128  }
 0x991   : > { %1962 = vsyncadd (!%p1815_p2), %s1535_s17, 4294967168  ;;  %p24_p3 = scmp.ge.s32.totalorder %s2096_s19, 4   ;;  %s2422_s29 = smov %s1969_s30 }
 0x992   : > { %s2423_s30 = smov %s1973_s15  ;;  %s2424_s15 = smov %s2107_s22 }
 0x993   : > { %s2425_s16 = smov %s2096_s19  ;;  %26 = sbr.rel (!%p24_p3) target bundleno = 9 (0x9), region = 114 }
 0x99a   :  { %1540 = vsyncpa [#allocation3], 1 }
 0x99b   :  { %1542 = vsyncpa [#allocation3 + $0x1], 1 }

</bundles_post_ra>
